<compile_context>
chip_gen: v7x
topology: tpu7x:2x2x1
jax: 0.10.0
libtpu: 0.0.40
codegen_flags: <defaults>
</compile_context>

<pallas_src>
import functools

import jax
import jax.numpy as jnp
from jax.experimental import pallas as pl
from jax.experimental.pallas import tpu as pltpu


# -----------------------------------------------------------------------------
# Fused kernel: per-batch im2col matmul into a VMEM-resident output block,
# then (last grid step) BatchNorm batch-stats + affine + ReLU in place.
# -----------------------------------------------------------------------------
def same_res_kernel(p_ref, w_ref, b_ref, g_ref, bt_ref, o_ref, *, eps, inv_cnt):
    # p_ref : (1, 9*Cin, H*W)   im2col patches for batch n (lane axis = H*W)
    # w_ref : (Cout, 9*Cin)     flattened conv weight
    # b_ref : (Cout, 1)         conv bias
    # g_ref : (Cout, 1)         BN gamma
    # bt_ref: (Cout, 1)         BN beta
    # o_ref : (N, Cout, H*W)    VMEM-resident output block (constant index_map)
    n = pl.program_id(0)

    # Conv for batch n: (Cout, 9*Cin) @ (9*Cin, H*W) -> (Cout, H*W), lane-dense.
    conv_n = jnp.dot(w_ref[...], p_ref[0], preferred_element_type=jnp.float32)
    o_ref[n] = conv_n + b_ref[...]          # (Cout,1) broadcasts along lanes

    @pl.when(n == pl.num_programs(0) - 1)
    def _():
        conv = o_ref[...]                                      # (N, Cout, HW)
        # Per-channel batch statistics (two-pass variance, lane reductions).
        s = jnp.sum(conv, axis=2, keepdims=True)               # (N, Cout, 1)
        mean = jnp.sum(s, axis=0, keepdims=True) * inv_cnt     # (1, Cout, 1)
        d = conv - mean
        sq = jnp.sum(d * d, axis=2, keepdims=True)             # (N, Cout, 1)
        var = jnp.sum(sq, axis=0, keepdims=True) * inv_cnt     # (1, Cout, 1)
        scale = g_ref[...][None] * jax.lax.rsqrt(var + eps)    # (1, Cout, 1)
        shift = bt_ref[...][None] - mean * scale
        o_ref[...] = jnp.maximum(conv * scale + shift, 0.0)


def same_res_forward(x_nchw, w_oihw, bias, gamma, beta, eps=1e-5):
    N, Cin, H, W = x_nchw.shape
    Cout = w_oihw.shape[0]
    K = 9 * Cin
    HW = H * W

    # ---- glue (pure data movement, fused by XLA into the patch producer) ----
    # im2col with channels-major rows: patches[n, (ky*3+kx)*Cin + ci, i*W+j]
    x_pad = jnp.pad(x_nchw, ((0, 0), (0, 0), (1, 1), (1, 1)))
    patches = jnp.concatenate(
        [x_pad[:, :, ky:ky + H, kx:kx + W]
         for ky in range(3) for kx in range(3)],
        axis=1).reshape(N, K, HW).astype(jnp.float32)
    # OIHW -> (Cout, ky, kx, Cin) -> (Cout, 9*Cin); row order matches patches.
    w_mat = jnp.transpose(w_oihw, (0, 2, 3, 1)).reshape(Cout, K).astype(jnp.float32)
    b2 = bias.reshape(Cout, 1).astype(jnp.float32)
    g2 = gamma.reshape(Cout, 1).astype(jnp.float32)
    bt2 = beta.reshape(Cout, 1).astype(jnp.float32)

    kern = functools.partial(same_res_kernel,
                             eps=float(eps),
                             inv_cnt=1.0 / float(N * H * W))

    out = pl.pallas_call(
        kern,
        out_shape=jax.ShapeDtypeStruct((N, Cout, HW), jnp.float32),
        grid_spec=pltpu.PrefetchScalarGridSpec(
            num_scalar_prefetch=0,
            grid=(N,),
            in_specs=[
                pl.BlockSpec((1, K, HW), lambda n: (n, 0, 0)),
                pl.BlockSpec((Cout, K), lambda n: (0, 0)),
                pl.BlockSpec((Cout, 1), lambda n: (0, 0)),
                pl.BlockSpec((Cout, 1), lambda n: (0, 0)),
                pl.BlockSpec((Cout, 1), lambda n: (0, 0)),
            ],
            # Constant block index -> whole activation resident in VMEM across
            # the batch grid; written back to HBM exactly once.
            out_specs=pl.BlockSpec((N, Cout, HW), lambda n: (0, 0, 0)),
        ),
        compiler_params=pltpu.CompilerParams(
            dimension_semantics=("arbitrary",)),   # output accumulates over n
    )(patches, w_mat, b2, g2, bt2)

    return out.reshape(N, Cout, H, W)              # already NCHW — no transpose


def reference_forward(x_nchw, w_oihw, bias, gamma, beta, eps=1e-5):
    x = jnp.transpose(x_nchw, (0, 2, 3, 1))
    w = jnp.transpose(w_oihw, (2, 3, 1, 0))
    conv = jax.lax.conv_general_dilated(
        x, w, window_strides=(1, 1), padding="SAME",
        dimension_numbers=("NHWC", "HWIO", "NHWC")) + bias
    mean = jnp.mean(conv, axis=(0, 1, 2))
    var = jnp.mean((conv - mean) ** 2, axis=(0, 1, 2))
    y = (conv - mean) / jnp.sqrt(var + eps) * gamma + beta
    y = jnp.maximum(y, 0.0)
    return jnp.transpose(y, (0, 3, 1, 2))


if __name__ == "__main__":
    key = jax.random.PRNGKey(0)
    k1, k2, k3 = jax.random.split(key, 3)

    N, Cin, Cout, H, W = 2, 4, 8, 16, 16

    x = jax.random.normal(k1, (N, Cin, H, W), jnp.float32)
    # Conv2d(inChannels=4, outChannels=8, kernel_size=3): weight (O, I, 3, 3)
    w = jax.random.normal(k2, (Cout, Cin, 3, 3), jnp.float32) * 0.1
    b = jax.random.normal(k3, (Cout,), jnp.float32) * 0.1
    # BatchNorm2d default init
    gamma = jnp.ones((Cout,), jnp.float32)
    beta = jnp.zeros((Cout,), jnp.float32)

    fwd = jax.jit(same_res_forward)
    out = jax.block_until_ready(fwd(x, w, b, gamma, beta))

    ref = reference_forward(x, w, b, gamma, beta)
    assert out.shape == (N, Cout, H, W)
    assert jnp.max(jnp.abs(out - ref)) < 1e-3

    print("KERNEL_OK")
</pallas_src>

<mosaic_0001>
module attributes {stable_mosaic.version = 11 : i64} {
  func.func @same_res_kernel(%arg0: i32, %arg1: memref<1x36x256xf32, #tpu.memory_space<vmem>>, %arg2: memref<8x36xf32, #tpu.memory_space<vmem>>, %arg3: memref<8x1xf32, #tpu.memory_space<vmem>>, %arg4: memref<8x1xf32, #tpu.memory_space<vmem>>, %arg5: memref<8x1xf32, #tpu.memory_space<vmem>>, %arg6: memref<2x8x256xf32, #tpu.memory_space<vmem>>) attributes {dimension_semantics = [#tpu.dimension_semantics<arbitrary>], iteration_bounds = array<i64: 2>, scalar_prefetch = 0 : i64, scratch_operands = 0 : i64, tpu.core_type = #tpu.core_type<tc>, window_params = [{transform_indices = @transform_0, window_bounds = array<i64: 1, 36, 256>}, {pipeline_mode = #tpu.pipeline_mode<synchronous>, transform_indices = @transform_1, window_bounds = array<i64: 8, 36>}, {pipeline_mode = #tpu.pipeline_mode<synchronous>, transform_indices = @transform_2, window_bounds = array<i64: 8, 1>}, {pipeline_mode = #tpu.pipeline_mode<synchronous>, transform_indices = @transform_3, window_bounds = array<i64: 8, 1>}, {pipeline_mode = #tpu.pipeline_mode<synchronous>, transform_indices = @transform_4, window_bounds = array<i64: 8, 1>}, {pipeline_mode = #tpu.pipeline_mode<synchronous>, transform_indices = @transform_5, window_bounds = array<i64: 2, 8, 256>}]} {
    %c0 = arith.constant 0 : index
    %c0_0 = arith.constant 0 : index
    %0 = vector.load %arg2[%c0, %c0_0] : memref<8x36xf32, #tpu.memory_space<vmem>>, vector<8x36xf32>
    %c0_1 = arith.constant 0 : index
    %c0_2 = arith.constant 0 : index
    %c0_3 = arith.constant 0 : index
    %1 = vector.load %arg1[%c0_1, %c0_2, %c0_3] : memref<1x36x256xf32, #tpu.memory_space<vmem>>, vector<1x36x256xf32>
    %2 = vector.shape_cast %1 : vector<1x36x256xf32> to vector<36x256xf32>
    %cst = arith.constant dense<0.000000e+00> : vector<8x256xf32>
    %3 = tpu.matmul %0, %2, %cst {dimension_numbers = #tpu.dot_dimension_numbers<[1], [0], [0], [1], [0, 0, 1, 1], [], []>} : vector<8x36xf32>, vector<36x256xf32>, vector<8x256xf32> -> vector<8x256xf32>
    %c0_4 = arith.constant 0 : index
    %c0_5 = arith.constant 0 : index
    %4 = vector.load %arg3[%c0_4, %c0_5] : memref<8x1xf32, #tpu.memory_space<vmem>>, vector<8x1xf32>
    %5 = vector.broadcast %4 : vector<8x1xf32> to vector<8x256xf32>
    %6 = arith.addf %3, %5 : vector<8x256xf32>
    %7 = arith.index_cast %arg0 : i32 to index
    %c0_6 = arith.constant 0 : index
    %c0_7 = arith.constant 0 : index
    %8 = vector.load %arg6[%7, %c0_6, %c0_7] : memref<2x8x256xf32, #tpu.memory_space<vmem>>, vector<1x8x256xf32>
    %9 = vector.shape_cast %8 : vector<1x8x256xf32> to vector<8x256xf32>
    %10 = vector.shape_cast %6 : vector<8x256xf32> to vector<1x8x256xf32>
    tpu.vector_store %arg6[%7, %c0_6, %c0_7], %10 {strides = array<i32>} : memref<2x8x256xf32, #tpu.memory_space<vmem>>, vector<1x8x256xf32>,
    %c1_i32 = arith.constant 1 : i32
    %11 = arith.cmpi eq, %arg0, %c1_i32 : i32
    %12 = arith.extui %11 : i1 to i32
    %c0_i32 = arith.constant 0 : i32
    %13 = arith.cmpi ne, %12, %c0_i32 : i32
    scf.if %13 {
      %c0_8 = arith.constant 0 : index
      %c0_9 = arith.constant 0 : index
      %c0_10 = arith.constant 0 : index
      %14 = vector.load %arg6[%c0_8, %c0_9, %c0_10] : memref<2x8x256xf32, #tpu.memory_space<vmem>>, vector<2x8x256xf32>
      %cst_11 = arith.constant dense<0.000000e+00> : vector<2x8xf32>
      %15 = vector.multi_reduction <add>, %14, %cst_11 [2] : vector<2x8x256xf32> to vector<2x8xf32>
      %16 = vector.shape_cast %15 : vector<2x8xf32> to vector<2x8x1xf32>
      %cst_12 = arith.constant dense<0.000000e+00> : vector<8x1xf32>
      %17 = vector.multi_reduction <add>, %16, %cst_12 [0] : vector<2x8x1xf32> to vector<8x1xf32>
      %18 = vector.shape_cast %17 : vector<8x1xf32> to vector<1x8x1xf32>
      %cst_13 = arith.constant 0.001953125 : f32
      %19 = vector.broadcast %cst_13 : f32 to vector<1x8x1xf32>
      %20 = arith.mulf %18, %19 : vector<1x8x1xf32>
      %21 = vector.broadcast %20 : vector<1x8x1xf32> to vector<2x8x256xf32>
      %22 = arith.subf %14, %21 : vector<2x8x256xf32>
      %23 = arith.mulf %22, %22 : vector<2x8x256xf32>
      %cst_14 = arith.constant dense<0.000000e+00> : vector<2x8xf32>
      %24 = vector.multi_reduction <add>, %23, %cst_14 [2] : vector<2x8x256xf32> to vector<2x8xf32>
      %25 = vector.shape_cast %24 : vector<2x8xf32> to vector<2x8x1xf32>
      %cst_15 = arith.constant dense<0.000000e+00> : vector<8x1xf32>
      %26 = vector.multi_reduction <add>, %25, %cst_15 [0] : vector<2x8x1xf32> to vector<8x1xf32>
      %27 = vector.shape_cast %26 : vector<8x1xf32> to vector<1x8x1xf32>
      %cst_16 = arith.constant 0.001953125 : f32
      %28 = vector.broadcast %cst_16 : f32 to vector<1x8x1xf32>
      %29 = arith.mulf %27, %28 : vector<1x8x1xf32>
      %c0_17 = arith.constant 0 : index
      %c0_18 = arith.constant 0 : index
      %30 = vector.load %arg4[%c0_17, %c0_18] : memref<8x1xf32, #tpu.memory_space<vmem>>, vector<8x1xf32>
      %31 = vector.shape_cast %30 : vector<8x1xf32> to vector<1x8x1xf32>
      %cst_19 = arith.constant 9.99999974E-6 : f32
      %32 = vector.broadcast %cst_19 : f32 to vector<1x8x1xf32>
      %33 = arith.addf %29, %32 : vector<1x8x1xf32>
      %34 = math.rsqrt %33 : vector<1x8x1xf32>
      %35 = arith.mulf %31, %34 : vector<1x8x1xf32>
      %c0_20 = arith.constant 0 : index
      %c0_21 = arith.constant 0 : index
      %36 = vector.load %arg5[%c0_20, %c0_21] : memref<8x1xf32, #tpu.memory_space<vmem>>, vector<8x1xf32>
      %37 = vector.shape_cast %36 : vector<8x1xf32> to vector<1x8x1xf32>
      %38 = arith.mulf %20, %35 : vector<1x8x1xf32>
      %39 = arith.subf %37, %38 : vector<1x8x1xf32>
      %40 = vector.broadcast %35 : vector<1x8x1xf32> to vector<2x8x256xf32>
      %41 = arith.mulf %14, %40 : vector<2x8x256xf32>
      %42 = vector.broadcast %39 : vector<1x8x1xf32> to vector<2x8x256xf32>
      %43 = arith.addf %41, %42 : vector<2x8x256xf32>
      %cst_22 = arith.constant 0.000000e+00 : f32
      %44 = vector.broadcast %cst_22 : f32 to vector<2x8x256xf32>
      %45 = arith.maximumf %43, %44 : vector<2x8x256xf32>
      %c0_23 = arith.constant 0 : index
      %c0_24 = arith.constant 0 : index
      %c0_25 = arith.constant 0 : index
      %46 = vector.load %arg6[%c0_23, %c0_24, %c0_25] : memref<2x8x256xf32, #tpu.memory_space<vmem>>, vector<2x8x256xf32>
      tpu.vector_store %arg6[%c0_23, %c0_24, %c0_25], %45 {strides = array<i32>} : memref<2x8x256xf32, #tpu.memory_space<vmem>>, vector<2x8x256xf32>,
    } else {
    }
    return
  }
  func.func @transform_0(%arg0: i32) -> (i32, i32, i32) {
    %c0_i32 = arith.constant 0 : i32
    %c0_i32_0 = arith.constant 0 : i32
    %c0_i32_1 = arith.constant 0 : i32
    return %arg0, %c0_i32, %c0_i32_0 : i32, i32, i32
  }
  func.func @transform_1(%arg0: i32) -> (i32, i32) {
    %c0_i32 = arith.constant 0 : i32
    %c0_i32_0 = arith.constant 0 : i32
    %c0_i32_1 = arith.constant 0 : i32
    return %c0_i32, %c0_i32_0 : i32, i32
  }
  func.func @transform_2(%arg0: i32) -> (i32, i32) {
    %c0_i32 = arith.constant 0 : i32
    %c0_i32_0 = arith.constant 0 : i32
    %c0_i32_1 = arith.constant 0 : i32
    return %c0_i32, %c0_i32_0 : i32, i32
  }
  func.func @transform_3(%arg0: i32) -> (i32, i32) {
    %c0_i32 = arith.constant 0 : i32
    %c0_i32_0 = arith.constant 0 : i32
    %c0_i32_1 = arith.constant 0 : i32
    return %c0_i32, %c0_i32_0 : i32, i32
  }
  func.func @transform_4(%arg0: i32) -> (i32, i32) {
    %c0_i32 = arith.constant 0 : i32
    %c0_i32_0 = arith.constant 0 : i32
    %c0_i32_1 = arith.constant 0 : i32
    return %c0_i32, %c0_i32_0 : i32, i32
  }
  func.func @transform_5(%arg0: i32) -> (i32, i32, i32) {
    %c0_i32 = arith.constant 0 : i32
    %c0_i32_0 = arith.constant 0 : i32
    %c0_i32_1 = arith.constant 0 : i32
    %c0_i32_2 = arith.constant 0 : i32
    return %c0_i32, %c0_i32_0, %c0_i32_1 : i32, i32, i32
  }
}

</mosaic_0001>

<bundles_post_ra>
// kernel: same_res_forward.1
= control target key start
LH: loop header
LB: loop body
LE: loop exit
PB: predicated region body
PF: predicated region fallthrough
CT: control target
= control target key end

     0   :  { %s489_s18 = smov 0   ;;  %s548_s0 = inlined_call_operand.vmem [shape: f32[2,36,256], index: 0, kind: input, shape index: {}]   ;;  %s549_s1 = inlined_call_operand.vmem [shape: f32[8,36], index: 1, kind: input, shape index: {}]   ;;  %s550_s2 = inlined_call_operand.vmem [shape: f32[8,1], index: 2, kind: input, shape index: {}]   ;;  %s551_s3 = inlined_call_operand.vmem [shape: f32[8,1], index: 3, kind: input, shape index: {}]   ;;  %s552_s4 = inlined_call_operand.vmem [shape: f32[8,1], index: 4, kind: input, shape index: {}]   ;;  %s553_s5 = inlined_call_operand.vmem [shape: f32[2,8,256], index: 5, kind: output, shape index: {}]  }
   0x1 LB: > { %s495_s19 = sadd.s32 4294967295, %s454_s18   ;;  %p412_p0 = scmp.ge.s32.totalorder %s454_s18, 1  ;;  %s454_s18 = sphi %s489_s18, %s15_s18  }
   0x2   : > { %p182_p1 = scmp.lt.s32.totalorder %s454_s18, 3 }
   0x4   : > { %p183_p2 = pnand %p412_p0, %p182_p1 }
   0x5   : > { %p205_p3 = scmp.lt.s32.totalorder (!%p183_p2), %s495_s19, 1  ;;  %v456_v0 = vmov (!%p183_p2), 0.0   ;;  %v457_v1 = vmov (!%p183_p2), 0   ;;  %v221_v2 = vld [vmem:[%s550_s2] sm:$0xff] (!%p183_p2)  ;;  %vm231_vm0 = vcmask (!%p183_p2), 1043456   ;;  %vm227_vm1 = vcmask (!%p183_p2), 293888  }
   0x6   : > { %186 = sbr.rel (%p183_p2) target bundleno = 715 (0x2cb), region = 40  ;;  %302 = vmatprep.mubr.f32.mxu0 (!%p183_p2), %v456_v0  ;;  %443 = vset.pattern.permute.xlu0 (!%p183_p2), %v457_v1  ;;  %v210_v17 = vld [vmem:[%s549_s1] sm:$0xff] (!%p183_p2)  ;;  %s422_s29 = sshll.u32 (!%p183_p2), %s495_s19, 4 }
   0x7   : > { %224 = vperm.xlu0 (!%p183_p2), %443, %v221_v2   ;;  %s311_s7 = scalar_lea.vmem (!%p183_p2), %s553_s5, %s422_s29  ;;  %p419_p4 = scmp.ne.s32.totalorder (!%p183_p2), %s495_s19, 1 }
   0xd   : > { %s206_s22 = scalar_select %p205_p3, %s495_s19, 1 }
   0xe   : > { %v458_v43 = vmov (!%p419_p4), 0   ;;  %v346_v49 = vld [vmem:[%s551_s3] sm:$0xff] (!%p419_p4) }
   0xf   : > { %s431_s23 = smul.u32 80, %s206_s22  ;;  %444 = vset.pattern.permute.xlu0 (!%p419_p4), %v458_v43  ;;  %445 = vset.pattern.permute.xlu1 (!%p419_p4), %v458_v43  ;;  %v350_v52 = vld [vmem:[%s552_s4] sm:$0xff] (!%p419_p4) }
  0x11   : > { %s209_s26 = scalar_lea.vmem %s548_s0, %s431_s23 }
  0x12   : > { %v212_v3 = vld [vmem:[%s209_s26 + $0x8] sm:$0xff]  ;;  %v214_v4 = vld [vmem:[%s209_s26 + $0x18] sm:$0xff]  ;;  %v211_v5 = vld [vmem:[%s209_s26] sm:$0xff] }
  0x13   : > { %v423_v6 = vpack.c.bf16 %v214_v4, %v212_v3  ;;  %v213_v7 = vld [vmem:[%s209_s26 + $0x10] sm:$0xff]  ;;  %v216_v8 = vld [vmem:[%s209_s26 + $0x28] sm:$0xff]  ;;  %v218_v9 = vld [vmem:[%s209_s26 + $0x38] sm:$0xff] }
  0x14   : > { %v425_v10 = vpack.c.bf16 %v213_v7, %v211_v5  ;;  %v427_v11 = vpack.c.bf16 %v218_v9, %v216_v8  ;;  %v215_v12 = vld [vmem:[%s209_s26 + $0x20] sm:$0xff]  ;;  %v217_v13 = vld [vmem:[%s209_s26 + $0x30] sm:$0xff]  ;;  %v220_v15 = vld [vmem:[%s209_s26 + $0x48] sm:$0xf] }
  0x15   : > { %424 = vmatprep.subr.bf16.mxu0 %v423_v6  ;;  %v429_v14 = vpack.c.bf16 %v217_v13, %v215_v12  ;;  %v219_v16 = vld [vmem:[%s209_s26 + $0x40] sm:$0xf] }
  0x16   : > { %426 = vmatpush1.bf16.msra.mxu0 %v425_v10 }
  0x17   : > { %428 = vmatprep.subr.bf16.mxu0 %v427_v11 }
  0x1a   : > { %430 = vmatpush1.bf16.msra.mxu0 %v429_v14 }
  0x1b   : > { %414 = vmatprep.subr.msk.mxu0 %vm231_vm0, %v220_v15 }
  0x1e   : > { %415 = vmatpush1.msk.msra.mxu0 %vm231_vm0, %v219_v16 }
  0x1f   : > { %416 = vmatmul.mubr.msk.f32.vlgmr.msra.gmra.mrb[0].mxu0 %vm227_vm1, %v210_v17 }
  0x86   : > { %v225_v18 = vpop.permute.xlu0 %224 }
  0xf0   : > { %317 = sbr.rel (%p419_p4) target bundleno = 715 (0x2cb), region = 44 }
  0xf2   : > { %v304_v19 = vpop.f32.mrb[0].mxu0 }
  0xf3   : > { %v305_v20 = vadd.f32 %v304_v19, %v225_v18  ;;  %v306_v21 = vpop.f32.mrb[1].mxu0 }
  0xf4   : > { %v307_v22 = vadd.f32 %v306_v21, %v225_v18 }
  0xf5   : > { %312 = vst [vmem:[%s311_s7] sm:$0xff] %v305_v20 }
  0xf6   : > { %313 = vst [vmem:[%s311_s7 + $0x8] sm:$0xff] %v307_v22 }
  0xfd   : > { %v318_v23 = vld [vmem:[%s553_s5] sm:$0xff]  ;;  %v319_v24 = vld [vmem:[%s553_s5 + $0x8] sm:$0xff]  ;;  %v320_v25 = vld [vmem:[%s553_s5 + $0x10] sm:$0xff] }
  0xfe   : > { %v322_v26 = vadd.f32 %v319_v24, %v318_v23  ;;  %v321_v27 = vld [vmem:[%s553_s5 + $0x18] sm:$0xff] }
  0xff   : > { %v325_v28 = vadd.f32 %v321_v27, %v320_v25 }
 0x100   : > { %323 = vadd.xlane.f32.xlu0 %v322_v26 }
 0x104   : > { %326 = vadd.xlane.f32.xlu0 %v325_v28 }
 0x18d   : > { %v324_v29 = vpop.xlane.xlu0 %323 }
 0x191   : > { %v327_v30 = vpop.xlane.xlu0 %326 }
 0x192   : > { %v328_v31 = vadd.f32 %v327_v30, %v324_v29 }
 0x194   : > { %v329_v32 = vmul.f32 0.001953125, %v328_v31 }
 0x196   : > { %v330_v33 = vsub.f32 %v318_v23, %v329_v32  ;;  %v331_v34 = vsub.f32 %v319_v24, %v329_v32  ;;  %v332_v35 = vsub.f32 %v320_v25, %v329_v32  ;;  %v333_v36 = vsub.f32 %v321_v27, %v329_v32 }
 0x198   : > { %v334_v37 = vmul.f32 %v330_v33, %v330_v33  ;;  %v335_v38 = vmul.f32 %v331_v34, %v331_v34  ;;  %v336_v40 = vmul.f32 %v332_v35, %v332_v35  ;;  %v337_v41 = vmul.f32 %v333_v36, %v333_v36 }
 0x19a   : > { %v338_v39 = vadd.f32 %v335_v38, %v334_v37  ;;  %v341_v42 = vadd.f32 %v337_v41, %v336_v40 }
 0x19c   : > { %339 = vadd.xlane.f32.xlu1 %v338_v39 }
 0x1a0   : > { %342 = vadd.xlane.f32.xlu1 %v341_v42 }
 0x229   : > { %v340_v44 = vpop.xlane.xlu1 %339 }
 0x22d   : > { %v343_v45 = vpop.xlane.xlu1 %342 }
 0x22e   : > { %v344_v46 = vadd.f32 %v343_v45, %v340_v44 }
 0x230   : > { %v345_v47 = vmul.f32 0.001953125, %v344_v46 }
 0x232   : > { %v347_v48 = vadd.f32 1e-05, %v345_v47 }
 0x234   : > { %446 = vrsqrt.f32 %v347_v48 }
 0x23e   : > { %v447_v50 = vpop.eup %446 }
 0x23f   : > { %v349_v51 = vmul.f32 %v447_v50, %v346_v49 }
 0x241   : > { %355 = vperm.xlu0 %444, %v349_v51   ;;  %v351_v53 = vmul.f32 %v349_v51, %v329_v32 }
 0x243   : > { %v352_v54 = vsub.f32 %v350_v52, %v351_v53 }
 0x245   : > { %364 = vperm.xlu1 %445, %v352_v54  }
 0x2c0   : > { %v356_v55 = vpop.permute.xlu0 %355 }
 0x2c1   : > { %v358_v56 = vmul.f32 %v356_v55, %v318_v23  ;;  %v359_v57 = vmul.f32 %v356_v55, %v319_v24  ;;  %v360_v58 = vmul.f32 %v356_v55, %v320_v25  ;;  %v361_v59 = vmul.f32 %v356_v55, %v321_v27 }
 0x2c4   : > { %v365_v60 = vpop.permute.xlu1 %364 }
 0x2c5   : > { %v367_v61 = vadd.f32 %v365_v60, %v358_v56  ;;  %v368_v62 = vadd.f32 %v365_v60, %v359_v57  ;;  %v369_v63 = vadd.f32 %v365_v60, %v360_v58  ;;  %v370_v0 = vadd.f32 %v365_v60, %v361_v59 }
 0x2c7   : > { %v371_v1 = vmax.f32 %v367_v61, 0.0  ;;  %v372_v2 = vmax.f32 %v368_v62, 0.0  ;;  %v373_v3 = vmax.f32 %v369_v63, 0.0  ;;  %v374_v4 = vmax.f32 %v370_v0, 0.0 }
 0x2c9   : > { %375 = vst [vmem:[%s553_s5] sm:$0xff] %v371_v1  ;;  %376 = vst [vmem:[%s553_s5 + $0x8] sm:$0xff] %v372_v2 }
 0x2ca   : > { %377 = vst [vmem:[%s553_s5 + $0x10] sm:$0xff] %v373_v3  ;;  %378 = vst [vmem:[%s553_s5 + $0x18] sm:$0xff] %v374_v4 }
 0x2cb PF: > { %s15_s18 = sadd.s32 1, %s454_s18  }
 0x2cc   : > { %p12_p5 = scmp.ge.s32.totalorder %s15_s18, 4  }
 0x2ce   :  { %14 = sbr.rel (!%p12_p5) target bundleno = 1 (0x1), region = 71 }

</bundles_post_ra>
